<compile_context>
chip_gen: v5e
topology: v5e:2x2
jax: 0.10.0
libtpu: 0.0.40
codegen_flags: <defaults>
</compile_context>

<pallas_src>
import jax
import jax.numpy as jnp
from jax.experimental import pallas as pl
from jax.experimental.pallas import tpu as pltpu


def _round_up(x, m):
    return ((x + m - 1) // m) * m


def _pad2d(a, rows, cols):
    r, c = a.shape
    return jnp.pad(a, ((0, rows - r), (0, cols - c)))


def _make_head_kernel(rep_pad, class_num):
    """Kernel closure over the padded rep width and the real class count."""

    def kernel(x_ref, wr_ref, br_ref, w13_ref, b13_ref, w2_ref, b2_ref,
               w4_ref, b4_ref, z_ref, c_ref, acc_ref):
        k = pl.program_id(1)

        @pl.when(k == 0)
        def _():
            acc_ref[...] = jnp.zeros_like(acc_ref)

        # ---- streamed K-reduction of the (synthetic) backbone matmul ----
        acc_ref[...] += jnp.dot(x_ref[...], wr_ref[...],
                                preferred_element_type=jnp.float32)

        @pl.when(k == pl.num_programs(1) - 1)
        def _():
            # backbone epilogue: bias + ReLU (f32 accumulator)
            h = jnp.maximum(acc_ref[...] + br_ref[...], 0.0)
            hb = h.astype(jnp.bfloat16)

            # fused first layers of both projectors: one [R, 2R] matmul
            tu = jnp.dot(hb, w13_ref[...], preferred_element_type=jnp.float32)
            tu = jnp.maximum(tu + b13_ref[...], 0.0)
            t = tu[:, :rep_pad].astype(jnp.bfloat16)   # instance branch hidden
            u = tu[:, rep_pad:].astype(jnp.bfloat16)   # cluster branch hidden

            # ---- instance head: Linear -> L2 normalize (dim=1) ----
            z = jnp.dot(t, w2_ref[...], preferred_element_type=jnp.float32) + b2_ref[...]
            ssq = jnp.maximum(jnp.sum(z * z, axis=1, keepdims=True), 1e-24)
            r = jax.lax.rsqrt(ssq)                 # EUP
            r = r * (1.5 - 0.5 * ssq * r * r)      # 1 Newton step -> f32 accuracy
            z_ref[...] = z * r

            # ---- cluster head: Linear -> Softmax over real class columns ----
            logits = jnp.dot(u, w4_ref[...], preferred_element_type=jnp.float32) + b4_ref[...]
            col = jax.lax.broadcasted_iota(jnp.int32, logits.shape, 1)
            logits = jnp.where(col < class_num, logits, -1e30)  # mask padded cols
            m = jnp.max(logits, axis=1, keepdims=True)
            e = jnp.exp(logits - m)
            s = jnp.sum(e, axis=1, keepdims=True)
            rs = pl.reciprocal(s, approx=True)     # EUP vrcp
            rs = rs * (2.0 - s * rs)               # 1 Newton step -> f32 accuracy
            c_ref[...] = e * rs

    return kernel


def _head_call(x_pad, weights, Bt, Kt, rep_pad, feat_pad, cls_pad, class_num):
    wr, br, w13, b13, w2, b2, w4, b4 = weights
    B_pad, Din_pad = x_pad.shape
    nb = B_pad // Bt
    nk = Din_pad // Kt

    const = lambda i, k: (0, 0)   # weights/biases: resident, never re-DMA'd

    grid_spec = pltpu.PrefetchScalarGridSpec(
        num_scalar_prefetch=0,
        grid=(nb, nk),
        in_specs=[
            pl.BlockSpec((Bt, Kt), lambda i, k: (i, k)),       # x tile
            pl.BlockSpec((Kt, rep_pad), lambda i, k: (k, 0)),  # Wr tile (K stream)
            pl.BlockSpec((1, rep_pad), const),                 # br
            pl.BlockSpec((rep_pad, 2 * rep_pad), const),       # w1||w3
            pl.BlockSpec((1, 2 * rep_pad), const),             # b1||b3
            pl.BlockSpec((rep_pad, feat_pad), const),          # w2
            pl.BlockSpec((1, feat_pad), const),                # b2
            pl.BlockSpec((rep_pad, cls_pad), const),           # w4
            pl.BlockSpec((1, cls_pad), const),                 # b4
        ],
        out_specs=(
            pl.BlockSpec((Bt, feat_pad), lambda i, k: (i, 0)),  # z (resident over k)
            pl.BlockSpec((Bt, cls_pad), lambda i, k: (i, 0)),   # c (resident over k)
        ),
        scratch_shapes=[pltpu.VMEM((Bt, rep_pad), jnp.float32)],  # f32 accumulator
    )

    return pl.pallas_call(
        _make_head_kernel(rep_pad, class_num),
        out_shape=(
            jax.ShapeDtypeStruct((B_pad, feat_pad), jnp.float32),
            jax.ShapeDtypeStruct((B_pad, cls_pad), jnp.float32),
        ),
        grid_spec=grid_spec,
        compiler_params=pltpu.CompilerParams(
            dimension_semantics=("parallel", "arbitrary"),  # batch axis megacore-shardable
            vmem_limit_bytes=48 * 1024 * 1024,              # fits v7x's 64 MiB VMEM
        ),
    )(x_pad, wr, br, w13, b13, w2, b2, w4, b4)


def network_forward(x_i, x_j, params, rep_dim, feature_dim, class_num):
    """Mirrors Network.forward: returns (z_i, z_j, c_i, c_j)."""
    B = x_i.shape[0]
    # fuse both views into one launch: weights stream once, MXU M-dim doubled
    x = jnp.concatenate(
        [x_i.reshape(B, -1), x_j.reshape(B, -1)], axis=0
    ).astype(jnp.float32)
    total, d_in = x.shape

    # tile / padding choices (MXU- and lane-friendly)
    Kt = 512 if d_in >= 512 else _round_up(d_in, 128)
    Din_pad = _round_up(d_in, Kt)
    Bt = min(128, _round_up(total, 16))     # bf16-sublane-aligned batch tile
    B_pad = _round_up(total, Bt)
    rep_pad = _round_up(rep_dim, 128)
    feat_pad = _round_up(feature_dim, 128)
    cls_pad = _round_up(class_num, 128)

    x_pad = _pad2d(x, B_pad, Din_pad).astype(jnp.bfloat16)

    wr, br, w1, b1, w2, b2, w3, b3, w4, b4 = params
    wr_p = _pad2d(wr, Din_pad, rep_pad).astype(jnp.bfloat16)
    br_p = _pad2d(br, 1, rep_pad)                              # f32
    w13_p = jnp.concatenate(
        [_pad2d(w1, rep_pad, rep_pad), _pad2d(w3, rep_pad, rep_pad)], axis=1
    ).astype(jnp.bfloat16)
    b13_p = jnp.concatenate([_pad2d(b1, 1, rep_pad), _pad2d(b3, 1, rep_pad)], axis=1)
    w2_p = _pad2d(w2, rep_pad, feat_pad).astype(jnp.bfloat16)
    b2_p = _pad2d(b2, 1, feat_pad)
    w4_p = _pad2d(w4, rep_pad, cls_pad).astype(jnp.bfloat16)
    b4_p = _pad2d(b4, 1, cls_pad)

    z_all, c_all = _head_call(
        x_pad, (wr_p, br_p, w13_p, b13_p, w2_p, b2_p, w4_p, b4_p),
        Bt, Kt, rep_pad, feat_pad, cls_pad, class_num)

    z_all = z_all[:total, :feature_dim]
    c_all = c_all[:total, :class_num]
    return z_all[:B], z_all[B:], c_all[:B], c_all[B:]


def init_params(key, d_in, rep_dim, feature_dim, class_num):
    """Deterministic PyTorch-Linear-style init; weights stored as [in, out]."""
    def linear(k, fan_in, fan_out):
        k1, k2 = jax.random.split(k)
        bound = 1.0 / jnp.sqrt(fan_in)
        w = jax.random.uniform(k1, (fan_in, fan_out), jnp.float32, -bound, bound)
        b = jax.random.uniform(k2, (1, fan_out), jnp.float32, -bound, bound)
        return w, b

    ks = jax.random.split(key, 5)
    wr, br = linear(ks[0], d_in, rep_dim)          # synthetic resnet feature layer
    w1, b1 = linear(ks[1], rep_dim, rep_dim)       # instance proj layer 1
    w2, b2 = linear(ks[2], rep_dim, feature_dim)   # instance proj layer 2
    w3, b3 = linear(ks[3], rep_dim, rep_dim)       # cluster proj layer 1
    w4, b4 = linear(ks[4], rep_dim, class_num)     # cluster proj layer 2
    return (wr, br, w1, b1, w2, b2, w3, b3, w4, b4)


if __name__ == "__main__":
    # Small shapes consistent with the module's forward pass.
    B, C, H, W = 2, 4, 16, 16
    rep_dim, feature_dim, class_num = 32, 16, 8
    d_in = C * H * W

    key = jax.random.PRNGKey(0)
    k_params, k_xi, k_xj = jax.random.split(key, 3)

    params = init_params(k_params, d_in, rep_dim, feature_dim, class_num)
    x_i = jax.random.normal(k_xi, (B, C, H, W), jnp.float32)   # NCHW
    x_j = jax.random.normal(k_xj, (B, C, H, W), jnp.float32)   # NCHW

    z_i, z_j, c_i, c_j = network_forward(
        x_i, x_j, params, rep_dim, feature_dim, class_num)
    jax.block_until_ready((z_i, z_j, c_i, c_j))

    # sanity: shapes, z rows unit-norm, c rows sum to 1
    assert z_i.shape == (B, feature_dim) and z_j.shape == (B, feature_dim)
    assert c_i.shape == (B, class_num) and c_j.shape == (B, class_num)
    assert jnp.allclose(jnp.linalg.norm(z_i, axis=1), 1.0, atol=1e-4)
    assert jnp.allclose(jnp.linalg.norm(z_j, axis=1), 1.0, atol=1e-4)
    assert jnp.allclose(jnp.sum(c_i, axis=1), 1.0, atol=1e-4)
    assert jnp.allclose(jnp.sum(c_j, axis=1), 1.0, atol=1e-4)

    print("KERNEL_OK")
</pallas_src>

<mosaic_0001>
module attributes {stable_mosaic.version = 11 : i64} {
  func.func @kernel(%arg0: i32, %arg1: i32, %arg2: memref<16x512xbf16, #tpu.memory_space<vmem>>, %arg3: memref<512x128xbf16, #tpu.memory_space<vmem>>, %arg4: memref<1x128xf32, #tpu.memory_space<vmem>>, %arg5: memref<128x256xbf16, #tpu.memory_space<vmem>>, %arg6: memref<1x256xf32, #tpu.memory_space<vmem>>, %arg7: memref<128x128xbf16, #tpu.memory_space<vmem>>, %arg8: memref<1x128xf32, #tpu.memory_space<vmem>>, %arg9: memref<128x128xbf16, #tpu.memory_space<vmem>>, %arg10: memref<1x128xf32, #tpu.memory_space<vmem>>, %arg11: memref<16x128xf32, #tpu.memory_space<vmem>>, %arg12: memref<16x128xf32, #tpu.memory_space<vmem>>, %arg13: memref<16x128xf32, #tpu.memory_space<vmem>>) attributes {dimension_semantics = [#tpu.dimension_semantics<parallel>, #tpu.dimension_semantics<arbitrary>], iteration_bounds = array<i64: 1, 2>, scalar_prefetch = 0 : i64, scratch_operands = 1 : i64, tpu.core_type = #tpu.core_type<tc>, window_params = [{transform_indices = @transform_0, window_bounds = array<i64: 16, 512>}, {transform_indices = @transform_1, window_bounds = array<i64: 512, 128>}, {pipeline_mode = #tpu.pipeline_mode<synchronous>, transform_indices = @transform_2, window_bounds = array<i64: 1, 128>}, {pipeline_mode = #tpu.pipeline_mode<synchronous>, transform_indices = @transform_3, window_bounds = array<i64: 128, 256>}, {pipeline_mode = #tpu.pipeline_mode<synchronous>, transform_indices = @transform_4, window_bounds = array<i64: 1, 256>}, {pipeline_mode = #tpu.pipeline_mode<synchronous>, transform_indices = @transform_5, window_bounds = array<i64: 128, 128>}, {pipeline_mode = #tpu.pipeline_mode<synchronous>, transform_indices = @transform_6, window_bounds = array<i64: 1, 128>}, {pipeline_mode = #tpu.pipeline_mode<synchronous>, transform_indices = @transform_7, window_bounds = array<i64: 128, 128>}, {pipeline_mode = #tpu.pipeline_mode<synchronous>, transform_indices = @transform_8, window_bounds = array<i64: 1, 128>}, {transform_indices = @transform_9, window_bounds = array<i64: 16, 128>}, {transform_indices = @transform_10, window_bounds = array<i64: 16, 128>}]} {
    %c0_i32 = arith.constant 0 : i32
    %0 = arith.cmpi eq, %arg1, %c0_i32 : i32
    %1 = arith.extui %0 : i1 to i32
    %c0_i32_0 = arith.constant 0 : i32
    %2 = arith.cmpi ne, %1, %c0_i32_0 : i32
    scf.if %2 {
      %cst_9 = arith.constant 0.000000e+00 : f32
      %12 = vector.broadcast %cst_9 : f32 to vector<16x128xf32>
      %c0_10 = arith.constant 0 : index
      %c0_11 = arith.constant 0 : index
      %13 = vector.load %arg13[%c0_10, %c0_11] : memref<16x128xf32, #tpu.memory_space<vmem>>, vector<16x128xf32>
      tpu.vector_store %arg13[%c0_10, %c0_11], %12 {strides = array<i32>} : memref<16x128xf32, #tpu.memory_space<vmem>>, vector<16x128xf32>,
    } else {
    }
    %c0 = arith.constant 0 : index
    %c0_1 = arith.constant 0 : index
    %3 = vector.load %arg13[%c0, %c0_1] : memref<16x128xf32, #tpu.memory_space<vmem>>, vector<16x128xf32>
    %c0_2 = arith.constant 0 : index
    %c0_3 = arith.constant 0 : index
    %4 = vector.load %arg2[%c0_2, %c0_3] : memref<16x512xbf16, #tpu.memory_space<vmem>>, vector<16x512xbf16>
    %c0_4 = arith.constant 0 : index
    %c0_5 = arith.constant 0 : index
    %5 = vector.load %arg3[%c0_4, %c0_5] : memref<512x128xbf16, #tpu.memory_space<vmem>>, vector<512x128xbf16>
    %cst = arith.constant dense<0.000000e+00> : vector<16x128xf32>
    %6 = tpu.matmul %4, %5, %cst {dimension_numbers = #tpu.dot_dimension_numbers<[1], [0], [0], [1], [0, 0, 1, 1], [], []>} : vector<16x512xbf16>, vector<512x128xbf16>, vector<16x128xf32> -> vector<16x128xf32>
    %7 = arith.addf %3, %6 : vector<16x128xf32>
    %c0_6 = arith.constant 0 : index
    %c0_7 = arith.constant 0 : index
    %8 = vector.load %arg13[%c0_6, %c0_7] : memref<16x128xf32, #tpu.memory_space<vmem>>, vector<16x128xf32>
    tpu.vector_store %arg13[%c0_6, %c0_7], %7 {strides = array<i32>} : memref<16x128xf32, #tpu.memory_space<vmem>>, vector<16x128xf32>,
    %c1_i32 = arith.constant 1 : i32
    %9 = arith.cmpi eq, %arg1, %c1_i32 : i32
    %10 = arith.extui %9 : i1 to i32
    %c0_i32_8 = arith.constant 0 : i32
    %11 = arith.cmpi ne, %10, %c0_i32_8 : i32
    scf.if %11 {
      %c0_9 = arith.constant 0 : index
      %c0_10 = arith.constant 0 : index
      %12 = vector.load %arg13[%c0_9, %c0_10] : memref<16x128xf32, #tpu.memory_space<vmem>>, vector<16x128xf32>
      %c0_11 = arith.constant 0 : index
      %c0_12 = arith.constant 0 : index
      %13 = vector.load %arg4[%c0_11, %c0_12] : memref<1x128xf32, #tpu.memory_space<vmem>>, vector<1x128xf32>
      %14 = vector.broadcast %13 : vector<1x128xf32> to vector<16x128xf32>
      %15 = arith.addf %12, %14 : vector<16x128xf32>
      %cst_13 = arith.constant 0.000000e+00 : f32
      %16 = vector.broadcast %cst_13 : f32 to vector<16x128xf32>
      %17 = arith.maximumf %15, %16 : vector<16x128xf32>
      %18 = arith.truncf %17 : vector<16x128xf32> to vector<16x128xbf16>
      %c0_14 = arith.constant 0 : index
      %c0_15 = arith.constant 0 : index
      %19 = vector.load %arg5[%c0_14, %c0_15] : memref<128x256xbf16, #tpu.memory_space<vmem>>, vector<128x256xbf16>
      %cst_16 = arith.constant dense<0.000000e+00> : vector<16x256xf32>
      %20 = tpu.matmul %18, %19, %cst_16 {dimension_numbers = #tpu.dot_dimension_numbers<[1], [0], [0], [1], [0, 0, 1, 1], [], []>} : vector<16x128xbf16>, vector<128x256xbf16>, vector<16x256xf32> -> vector<16x256xf32>
      %c0_17 = arith.constant 0 : index
      %c0_18 = arith.constant 0 : index
      %21 = vector.load %arg6[%c0_17, %c0_18] : memref<1x256xf32, #tpu.memory_space<vmem>>, vector<1x256xf32>
      %22 = vector.broadcast %21 : vector<1x256xf32> to vector<16x256xf32>
      %23 = arith.addf %20, %22 : vector<16x256xf32>
      %cst_19 = arith.constant 0.000000e+00 : f32
      %24 = vector.broadcast %cst_19 : f32 to vector<16x256xf32>
      %25 = arith.maximumf %23, %24 : vector<16x256xf32>
      %26 = vector.extract_strided_slice %25 {offsets = [0, 0], sizes = [16, 128], strides = [1, 1]} : vector<16x256xf32> to vector<16x128xf32>
      %27 = arith.truncf %26 : vector<16x128xf32> to vector<16x128xbf16>
      %28 = vector.extract_strided_slice %25 {offsets = [0, 128], sizes = [16, 128], strides = [1, 1]} : vector<16x256xf32> to vector<16x128xf32>
      %29 = arith.truncf %28 : vector<16x128xf32> to vector<16x128xbf16>
      %c0_20 = arith.constant 0 : index
      %c0_21 = arith.constant 0 : index
      %30 = vector.load %arg7[%c0_20, %c0_21] : memref<128x128xbf16, #tpu.memory_space<vmem>>, vector<128x128xbf16>
      %cst_22 = arith.constant dense<0.000000e+00> : vector<16x128xf32>
      %31 = tpu.matmul %27, %30, %cst_22 {dimension_numbers = #tpu.dot_dimension_numbers<[1], [0], [0], [1], [0, 0, 1, 1], [], []>} : vector<16x128xbf16>, vector<128x128xbf16>, vector<16x128xf32> -> vector<16x128xf32>
      %c0_23 = arith.constant 0 : index
      %c0_24 = arith.constant 0 : index
      %32 = vector.load %arg8[%c0_23, %c0_24] : memref<1x128xf32, #tpu.memory_space<vmem>>, vector<1x128xf32>
      %33 = vector.broadcast %32 : vector<1x128xf32> to vector<16x128xf32>
      %34 = arith.addf %31, %33 : vector<16x128xf32>
      %35 = arith.mulf %34, %34 : vector<16x128xf32>
      %cst_25 = arith.constant dense<0.000000e+00> : vector<16xf32>
      %36 = vector.multi_reduction <add>, %35, %cst_25 [1] : vector<16x128xf32> to vector<16xf32>
      %37 = vector.shape_cast %36 : vector<16xf32> to vector<16x1xf32>
      %cst_26 = arith.constant 1.000000e-24 : f32
      %38 = vector.broadcast %cst_26 : f32 to vector<16x1xf32>
      %39 = arith.maximumf %37, %38 : vector<16x1xf32>
      %40 = math.rsqrt %39 : vector<16x1xf32>
      %cst_27 = arith.constant 5.000000e-01 : f32
      %41 = vector.broadcast %cst_27 : f32 to vector<16x1xf32>
      %42 = arith.mulf %41, %39 : vector<16x1xf32>
      %43 = arith.mulf %42, %40 : vector<16x1xf32>
      %44 = arith.mulf %43, %40 : vector<16x1xf32>
      %cst_28 = arith.constant 1.500000e+00 : f32
      %45 = vector.broadcast %cst_28 : f32 to vector<16x1xf32>
      %46 = arith.subf %45, %44 : vector<16x1xf32>
      %47 = arith.mulf %40, %46 : vector<16x1xf32>
      %48 = vector.broadcast %47 : vector<16x1xf32> to vector<16x128xf32>
      %49 = arith.mulf %34, %48 : vector<16x128xf32>
      %c0_29 = arith.constant 0 : index
      %c0_30 = arith.constant 0 : index
      %50 = vector.load %arg11[%c0_29, %c0_30] : memref<16x128xf32, #tpu.memory_space<vmem>>, vector<16x128xf32>
      tpu.vector_store %arg11[%c0_29, %c0_30], %49 {strides = array<i32>} : memref<16x128xf32, #tpu.memory_space<vmem>>, vector<16x128xf32>,
      %c0_31 = arith.constant 0 : index
      %c0_32 = arith.constant 0 : index
      %51 = vector.load %arg9[%c0_31, %c0_32] : memref<128x128xbf16, #tpu.memory_space<vmem>>, vector<128x128xbf16>
      %cst_33 = arith.constant dense<0.000000e+00> : vector<16x128xf32>
      %52 = tpu.matmul %29, %51, %cst_33 {dimension_numbers = #tpu.dot_dimension_numbers<[1], [0], [0], [1], [0, 0, 1, 1], [], []>} : vector<16x128xbf16>, vector<128x128xbf16>, vector<16x128xf32> -> vector<16x128xf32>
      %c0_34 = arith.constant 0 : index
      %c0_35 = arith.constant 0 : index
      %53 = vector.load %arg10[%c0_34, %c0_35] : memref<1x128xf32, #tpu.memory_space<vmem>>, vector<1x128xf32>
      %54 = vector.broadcast %53 : vector<1x128xf32> to vector<16x128xf32>
      %55 = arith.addf %52, %54 : vector<16x128xf32>
      %56 = tpu.iota {dimensions = array<i32: 1>} : vector<16x128xi32>
      %c8_i32 = arith.constant 8 : i32
      %57 = vector.broadcast %c8_i32 : i32 to vector<16x128xi32>
      %58 = arith.cmpi slt, %56, %57 : vector<16x128xi32>
      %cst_36 = arith.constant -1.000000e+30 : f32
      %59 = vector.broadcast %cst_36 : f32 to vector<16x128xf32>
      %60 = arith.select %58, %55, %59 : vector<16x128xi1>, vector<16x128xf32>
      %cst_37 = arith.constant dense<0xFF800000> : vector<16xf32>
      %61 = vector.multi_reduction <maximumf>, %60, %cst_37 [1] : vector<16x128xf32> to vector<16xf32>
      %62 = vector.shape_cast %61 : vector<16xf32> to vector<16x1xf32>
      %63 = vector.broadcast %62 : vector<16x1xf32> to vector<16x128xf32>
      %64 = arith.subf %60, %63 : vector<16x128xf32>
      %65 = math.exp %64 : vector<16x128xf32>
      %cst_38 = arith.constant dense<0.000000e+00> : vector<16xf32>
      %66 = vector.multi_reduction <add>, %65, %cst_38 [1] : vector<16x128xf32> to vector<16xf32>
      %67 = vector.shape_cast %66 : vector<16xf32> to vector<16x1xf32>
      %68 = tpu.reciprocal %67 {approx = true} : vector<16x1xf32> -> vector<16x1xf32>
      %69 = arith.mulf %67, %68 : vector<16x1xf32>
      %cst_39 = arith.constant 2.000000e+00 : f32
      %70 = vector.broadcast %cst_39 : f32 to vector<16x1xf32>
      %71 = arith.subf %70, %69 : vector<16x1xf32>
      %72 = arith.mulf %68, %71 : vector<16x1xf32>
      %73 = vector.broadcast %72 : vector<16x1xf32> to vector<16x128xf32>
      %74 = arith.mulf %65, %73 : vector<16x128xf32>
      %c0_40 = arith.constant 0 : index
      %c0_41 = arith.constant 0 : index
      %75 = vector.load %arg12[%c0_40, %c0_41] : memref<16x128xf32, #tpu.memory_space<vmem>>, vector<16x128xf32>
      tpu.vector_store %arg12[%c0_40, %c0_41], %74 {strides = array<i32>} : memref<16x128xf32, #tpu.memory_space<vmem>>, vector<16x128xf32>,
    } else {
    }
    return
  }
  func.func @transform_0(%arg0: i32, %arg1: i32) -> (i32, i32) {
    %c0_i32 = arith.constant 0 : i32
    return %arg0, %arg1 : i32, i32
  }
  func.func @transform_1(%arg0: i32, %arg1: i32) -> (i32, i32) {
    %c0_i32 = arith.constant 0 : i32
    %c0_i32_0 = arith.constant 0 : i32
    return %arg1, %c0_i32 : i32, i32
  }
  func.func @transform_2(%arg0: i32, %arg1: i32) -> (i32, i32) {
    %c0_i32 = arith.constant 0 : i32
    %c0_i32_0 = arith.constant 0 : i32
    %c0_i32_1 = arith.constant 0 : i32
    return %c0_i32, %c0_i32_0 : i32, i32
  }
  func.func @transform_3(%arg0: i32, %arg1: i32) -> (i32, i32) {
    %c0_i32 = arith.constant 0 : i32
    %c0_i32_0 = arith.constant 0 : i32
    %c0_i32_1 = arith.constant 0 : i32
    return %c0_i32, %c0_i32_0 : i32, i32
  }
  func.func @transform_4(%arg0: i32, %arg1: i32) -> (i32, i32) {
    %c0_i32 = arith.constant 0 : i32
    %c0_i32_0 = arith.constant 0 : i32
    %c0_i32_1 = arith.constant 0 : i32
    return %c0_i32, %c0_i32_0 : i32, i32
  }
  func.func @transform_5(%arg0: i32, %arg1: i32) -> (i32, i32) {
    %c0_i32 = arith.constant 0 : i32
    %c0_i32_0 = arith.constant 0 : i32
    %c0_i32_1 = arith.constant 0 : i32
    return %c0_i32, %c0_i32_0 : i32, i32
  }
  func.func @transform_6(%arg0: i32, %arg1: i32) -> (i32, i32) {
    %c0_i32 = arith.constant 0 : i32
    %c0_i32_0 = arith.constant 0 : i32
    %c0_i32_1 = arith.constant 0 : i32
    return %c0_i32, %c0_i32_0 : i32, i32
  }
  func.func @transform_7(%arg0: i32, %arg1: i32) -> (i32, i32) {
    %c0_i32 = arith.constant 0 : i32
    %c0_i32_0 = arith.constant 0 : i32
    %c0_i32_1 = arith.constant 0 : i32
    return %c0_i32, %c0_i32_0 : i32, i32
  }
  func.func @transform_8(%arg0: i32, %arg1: i32) -> (i32, i32) {
    %c0_i32 = arith.constant 0 : i32
    %c0_i32_0 = arith.constant 0 : i32
    %c0_i32_1 = arith.constant 0 : i32
    return %c0_i32, %c0_i32_0 : i32, i32
  }
  func.func @transform_9(%arg0: i32, %arg1: i32) -> (i32, i32) {
    %c0_i32 = arith.constant 0 : i32
    %c0_i32_0 = arith.constant 0 : i32
    return %arg0, %c0_i32 : i32, i32
  }
  func.func @transform_10(%arg0: i32, %arg1: i32) -> (i32, i32) {
    %c0_i32 = arith.constant 0 : i32
    %c0_i32_0 = arith.constant 0 : i32
    return %arg0, %c0_i32 : i32, i32
  }
}

</mosaic_0001>

<bundles_post_ra>
// kernel: tpu_custom_call.1
= control target key start
LH: loop header
LB: loop body
LE: loop exit
PB: predicated region body
PF: predicated region fallthrough
CT: control target
= control target key end

     0   :  { %s2457_s0 = inlined_call_operand.hbm [shape: bf16[16,1024], index: 0, kind: input, shape index: {}]   ;;  %s2458_s1 = inlined_call_operand.hbm [shape: bf16[1024,128], index: 1, kind: input, shape index: {}]   ;;  %s2459_s2 = inlined_call_operand.vmem [shape: f32[1,128], index: 2, kind: input, shape index: {}]   ;;  %s2460_s3 = inlined_call_operand.hbm [shape: bf16[128,256], index: 3, kind: input, shape index: {}]   ;;  %s2461_s4 = inlined_call_operand.vmem [shape: f32[1,256], index: 4, kind: input, shape index: {}]   ;;  %s2462_s5 = inlined_call_operand.hbm [shape: bf16[128,128], index: 5, kind: input, shape index: {}]   ;;  %s2463_s6 = inlined_call_operand.vmem [shape: f32[1,128], index: 6, kind: input, shape index: {}]   ;;  %s2464_s7 = inlined_call_operand.hbm [shape: bf16[128,128], index: 7, kind: input, shape index: {}]   ;;  %s2465_s8 = inlined_call_operand.vmem [shape: f32[1,128], index: 8, kind: input, shape index: {}]   ;;  %s2466_s9 = inlined_call_operand.hbm [shape: f32[16,128], index: 9, kind: output, shape index: {0}]   ;;  %s2467_s10 = inlined_call_operand.hbm [shape: f32[16,128], index: 10, kind: output, shape index: {1}]  }
   0x1   :  { %2473 = sst [smem:[#allocation25_spill]] %s2457_s0 }
   0x2   :  { %2474 = sst [smem:[#allocation26_spill]] %s2460_s3 }
   0x3   :  { %2475 = sst [smem:[#allocation27_spill]] %s2462_s5 }
   0x4   :  { %2476 = sst [smem:[#allocation28_spill]] %s2464_s7 }
   0x5   :  { %2477 = sst [smem:[#allocation29_spill]] %s2466_s9 }
   0x6   :  { %2478 = sst [smem:[#allocation30_spill]] %s2467_s10 }
   0x7   :  { %16 = vsyncpa [#allocation4], 0 }
   0x8   :  { %18 = vsyncpa [#allocation4 + $0x1], 0 }
   0x9   :  { %19 = vsyncpa [#allocation7], 0 }
   0xa   :  { %21 = vsyncpa [#allocation7 + $0x1], 0 }
   0xb   :  { %22 = vsyncpa [#allocation10], 0 }
   0xc   :  { %23 = vsyncpa [#allocation5], 0 }
   0xd   :  { %24 = vsyncpa [#allocation14], 0  ;;  %s2232_s13 = smov 0   ;;  %s2234_s14 = smov 0  }
   0xe   :  { %s2236_s15 = smov 0   ;;  %s2238_s16 = smov 0  }
   0xf   :  { %s2240_s17 = smov 0   ;;  %s2242_s18 = smov 0  }
  0x10 LB: > { %2479 = sst [smem:[#allocation21_spill]] %s2148_s15  ;;  %s2261_s19 = sadd.s32 4294967295, %s2160_s18   ;;  %s2160_s18 = sphi %s2242_s18, %s30_s18   ;;  %s2156_s17 = sphi %s2240_s17, %s2503_s17   ;;  %s2152_s16 = sphi %s2238_s16, %s2502_s16   ;;  %s2148_s15 = sphi %s2236_s15, %s2501_s15   ;;  %s2144_s14 = sphi %s2234_s14, %s2500_s14   ;;  %s2140_s13 = sphi %s2232_s13, %s2499_s13  }
  0x11   : > { %2480 = sst [smem:[#allocation22_spill]] %s2160_s18  ;;  %p64_p0 = scmp.ne.s32.totalorder %s2144_s14, %s2140_s13 }
  0x12   : > { %p65_p1 = scmp.eq.s32.totalorder %s2261_s19, 0  ;;  %p1387_p2 = scmp.ge.s32.totalorder %s2160_s18, 1 }
  0x13   : > { %p300_p3 = scmp.lt.s32.totalorder %s2160_s18, 3  ;;  %s2482_s3 = sld [smem:[#allocation26_spill]] }
  0x14   : > { %p2269_p4 = por %p65_p1, %p64_p0  ;;  %s2162_s25 = smov [#allocation8]  }
  0x15   : > { %p2276_p5 = pnand %p1387_p2, %p300_p3  ;;  %s316_s26 = sshll.u32 %s2162_s25, 4  ;;  %s317_s26 = int_to_ptr.vmem [resolvable:$true] %s316_s26 }
  0x16   : > { %s2485_s5 = sld [smem:[#allocation27_spill]]  ;;  %s2163_s11 = smov 128  }
  0x17   : > { %p1778_p6 = pneg %p2276_p5  ;;  %s2164_s12 = smov 8  }
  0x18   : > { %s2165_s13 = smov [#allocation9]   ;;  %s2468_s22 = smov 64  }
  0x19   : > { %s314_s23 = sshll.u32 %s2482_s3, 4  ;;  %p2284_p7 = pnand %p1778_p6, %p65_p1  ;;  %s315_s23 = int_to_ptr.hbm [resolvable:$true] %s314_s23 }
  0x1a   : > { %s333_s21 = sshll.u32 %s2165_s13, 4  ;;  %s2469_s25 = smov 4   ;;  %s334_s21 = int_to_ptr.vmem [resolvable:$true] %s333_s21 }
  0x1b   : > { %1781 = dma.hbm_to_vmem [thread:$0]  (!%p2284_p7), %s315_s23, 2048, %s317_s26, [#allocation7], %s2163_s11, %s2163_s11, %s2164_s12  }
  0x1c   : > { %s331_s30 = sshll.u32 %s2485_s5, 4  ;;  %s2486_s7 = sld [smem:[#allocation28_spill]]  ;;  %s332_s30 = int_to_ptr.hbm [resolvable:$true] %s331_s30 }
  0x1d   : > { %1784 = dma.hbm_to_vmem [thread:$0]  (!%p2284_p7), %s332_s30, 1024, %s334_s21, [#allocation10], %s2468_s22, %s2468_s22, %s2469_s25  }
  0x1e   : > { %s2168_s23 = smov [#allocation11]   ;;  %s51_s11 = sadd.s32 1, %s2148_s15 }
  0x1f   : > { %s350_s26 = sshll.u32 %s2168_s23, 4  ;;  %s39_s12 = sadd.s32 1, %s2156_s17  ;;  %s351_s26 = int_to_ptr.vmem [resolvable:$true] %s350_s26 }
  0x20   : > { %p58_p8 = scmp.ne.s32.totalorder %s2148_s15, %s2144_s14  ;;  %p40_p9 = scmp.ge.s32.totalorder %s39_s12, 2 }
  0x21   : > { %p59_p10 = scmp.eq.s32.totalorder %s2160_s18, 0  ;;  %p1798_p11 = scmp.lt.s32.totalorder %s2160_s18, 2 }
  0x22   : > { %s348_s3 = sshll.u32 %s2486_s7, 4  ;;  %s367_s30 = sand.u32 1, %s2148_s15   ;;  %s349_s3 = int_to_ptr.hbm [resolvable:$true] %s348_s3 }
  0x23   : > { %1787 = dma.hbm_to_vmem [thread:$0]  (!%p2284_p7), %s349_s3, 1024, %s351_s26, [#allocation10], %s2468_s22, %s2468_s22, %s2469_s25  }
  0x24   : > { %s2505_s12 = smov (%p40_p9, %s39_s12), 0  ;;  %p60_p12 = por %p59_p10, %p58_p8 }
  0x25   : > { %2487 = sst [smem:[#allocation23_spill]] %s2505_s12  ;;  %s47_s13 = ssub.s32 %s2156_s17, %s2505_s12 }
  0x26   : > { %s1392_s27 = sshll.u32 %s367_s30, 5  ;;  %p49_p13 = scmp.eq.s32.totalorder %s47_s13, 0 }
  0x27   : > { %s1684_s21 = sshll.u32 %s2156_s17, 4  ;;  %s371_s3 = scalar_lea.vmem [#allocation3], %s1392_s27 }
  0x28   : > { %s382_s28 = sshll.u32 %s371_s3, 4  ;;  %s2489_s0 = sld [smem:[#allocation25_spill]]  ;;  %s383_s28 = int_to_ptr.vmem [resolvable:$true] %s382_s28 }
  0x29   : > { %s2319_s29 = scalar_select %p49_p13, %s2148_s15, %s51_s11  }
  0x2a   : > { %p2326_p0 = pnand %p1798_p11, %p60_p12  ;;  %s392_s13 = sand.u32 1, %s2160_s18  }
  0x2b   : > { %2488 = sst [smem:[#allocation24_spill]] %s2319_s29  ;;  %s368_s7 = scalar_lea.sflag [#allocation4], %s367_s30 }
  0x2c   : > { %s2169_s27 = smov 512   ;;  %s2170_s3 = smov 256  }
  0x2d   : > { %s2171_s11 = smov 16   ;;  %s1395_s12 = sshll.u32 %s367_s30, 8 }
  0x2e   : > { %s379_s22 = scalar_lea.hbm %s2489_s0, %s1684_s21  ;;  %s1685_s23 = sshll.u32 %s2156_s17, 8 }
  0x2f   : > { %s380_s25 = sshll.u32 %s379_s22, 4  ;;  %s401_s22 = scalar_lea.hbm %s2458_s1, %s1685_s23  ;;  %s381_s25 = int_to_ptr.hbm [resolvable:$true] %s380_s25 }
  0x30   : > { %1791 = dma.hbm_to_vmem [thread:$0]  (!%p2326_p0), %s381_s25, 512, %s383_s28, %s368_s7, %s2169_s27, %s2170_s3, %s2171_s11  }
  0x31   : > { %s396_s0 = scalar_lea.vmem [#allocation6], %s1395_s12  ;;  %s402_s15 = sshll.u32 %s401_s22, 4  ;;  %s403_s15 = int_to_ptr.hbm [resolvable:$true] %s402_s15 }
  0x32   : > { %s404_s29 = sshll.u32 %s396_s0, 4  ;;  %s393_s10 = scalar_lea.sflag [#allocation7], %s392_s13  ;;  %s405_s29 = int_to_ptr.vmem [resolvable:$true] %s404_s29 }
  0x33   : > { %s2491_s18 = smov 4   ;;  %s2492_s9 = smov 64  }
  0x34   : > { %1794 = dma.hbm_to_vmem [thread:$0]  (!%p2326_p0), %s403_s15, 4096, %s405_s29, %s393_s10, %s2492_s9, %s2492_s9, %s2491_s18  }
  0x35   : > { %416 = sbr.rel (%p2276_p5) target bundleno = 849 (0x351), region = 56  ;;  %s418_s7 = sand.u32 (!%p2276_p5), 1, %s2144_s14  }
  0x36   : > { %s1399_s25 = sshll.u32 (!%p2276_p5), %s418_s7, 5  ;;  %s419_s30 = scalar_lea.sflag (!%p2276_p5), [#allocation4], %s418_s7 }
  0x37   : > { %s2345_s28 = scalar_lea.vmem (!%p2276_p5), [#allocation3], %s1399_s25 }
  0x3a   : > { %2115 = dma.done.wait (%p2269_p4), %s419_s30, 512  }
  0x3b   : > { %2117 = vsyncadd (%p2269_p4), %s419_s30, 4294966784  ;;  %s428_s0 = sand.u32 1, %s2261_s19   ;;  %s1400_s5 = sshll.u32 %s418_s7, 8 }
  0x3c   : > { %s429_s9 = scalar_lea.sflag [#allocation7], %s428_s0  ;;  %s2352_s10 = scalar_lea.vmem [#allocation6], %s1400_s5 }
  0x3d   : > { %2119 = dma.done.wait (%p2269_p4), %s429_s9, 4096  }
  0x3e   : > { %2121 = vsyncadd (%p2269_p4), %s429_s9, 4294963200 }
  0x3f   : > { %2123 = dma.done.wait (%p65_p1), [#allocation7], 2048  }
  0x40   : > { %2125 = vsyncadd (%p65_p1), [#allocation7], 4294965248 }
  0x41   : > { %2127 = dma.done.wait (%p65_p1), [#allocation10], 2048  }
  0x42   : > { %2129 = vsyncadd (%p65_p1), [#allocation10], 4294965248  ;;  %p1404_p2 = scmp.ne.s32.totalorder %s2152_s16, 0 }
  0x44   : > { %493 = sbr.rel (%p1404_p2) target bundleno = 76 (0x4c), region = 80 }
  0x49   : > { %v2172_v0 = vmov 0.0  }
  0x4a   : > { %494 = vst [vmem:[#allocation2] sm:$0xff] %v2172_v0 }
  0x4b   : > { %495 = vst [vmem:[#allocation2 + $0x8] sm:$0xff] %v2172_v0 }
  0x4c PF: > { %v1697_v1 = vld [vmem:[%s2352_s10 + $0x38] sm:$0xff]  ;;  %v1696_v5 = vld [vmem:[%s2352_s10 + $0x30] sm:$0xff]  ;;  %v1695_v9 = vld [vmem:[%s2352_s10 + $0x28] sm:$0xff]  ;;  %p1549_p1 = scmp.ne.s32.totalorder %s2152_s16, 1 }
  0x4d   : > { %v1705_v2 = vld [vmem:[%s2352_s10 + $0x78] sm:$0xff]  ;;  %778 = vmatpush.bf16.msra.mxu0 %v1697_v1  ;;  %v1704_v6 = vld [vmem:[%s2352_s10 + $0x70] sm:$0xff]  ;;  %v1703_v10 = vld [vmem:[%s2352_s10 + $0x68] sm:$0xff] }
  0x4e   : > { %v1713_v3 = vld [vmem:[%s2352_s10 + $0xb8] sm:$0xff]  ;;  %792 = vmatpush.bf16.msra.mxu1 %v1705_v2  ;;  %v1712_v7 = vld [vmem:[%s2352_s10 + $0xb0] sm:$0xff]  ;;  %v1711_v11 = vld [vmem:[%s2352_s10 + $0xa8] sm:$0xff] }
  0x4f   : > { %v1721_v4 = vld [vmem:[%s2352_s10 + $0xf8] sm:$0xff]  ;;  %806 = vmatpush.bf16.msra.mxu2 %v1713_v3  ;;  %v1720_v8 = vld [vmem:[%s2352_s10 + $0xf0] sm:$0xff]  ;;  %v1719_v12 = vld [vmem:[%s2352_s10 + $0xe8] sm:$0xff] }
  0x50   : > { %820 = vmatpush.bf16.msra.mxu3 %v1721_v4  ;;  %v1694_v13 = vld [vmem:[%s2352_s10 + $0x20] sm:$0xff]  ;;  %v1693_v17 = vld [vmem:[%s2352_s10 + $0x18] sm:$0xff]  ;;  %v1692_v21 = vld [vmem:[%s2352_s10 + $0x10] sm:$0xff] }
  0x51   : > { %779 = vmatpush.bf16.msra.mxu0 %v1696_v5  ;;  %v1702_v14 = vld [vmem:[%s2352_s10 + $0x60] sm:$0xff]  ;;  %v1701_v18 = vld [vmem:[%s2352_s10 + $0x58] sm:$0xff]  ;;  %v1700_v22 = vld [vmem:[%s2352_s10 + $0x50] sm:$0xff] }
  0x52   : > { %793 = vmatpush.bf16.msra.mxu1 %v1704_v6  ;;  %v1710_v15 = vld [vmem:[%s2352_s10 + $0xa0] sm:$0xff]  ;;  %v1709_v19 = vld [vmem:[%s2352_s10 + $0x98] sm:$0xff]  ;;  %v1708_v23 = vld [vmem:[%s2352_s10 + $0x90] sm:$0xff] }
  0x53   : > { %807 = vmatpush.bf16.msra.mxu2 %v1712_v7  ;;  %v1718_v16 = vld [vmem:[%s2352_s10 + $0xe0] sm:$0xff]  ;;  %v1717_v20 = vld [vmem:[%s2352_s10 + $0xd8] sm:$0xff]  ;;  %v1716_v24 = vld [vmem:[%s2352_s10 + $0xd0] sm:$0xff] }
  0x54   : > { %821 = vmatpush.bf16.msra.mxu3 %v1720_v8  ;;  %v1691_v25 = vld [vmem:[%s2352_s10 + $0x8] sm:$0xff]  ;;  %v1690_v29 = vld [vmem:[%s2352_s10] sm:$0xff]  ;;  %v1688_v34 = vld [vmem:[%s2345_s28 + $0xc] sm:$0xf0] }
  0x55   : > { %780 = vmatpush.bf16.msra.mxu0 %v1695_v9  ;;  %v1699_v26 = vld [vmem:[%s2352_s10 + $0x48] sm:$0xff]  ;;  %v1698_v30 = vld [vmem:[%s2352_s10 + $0x40] sm:$0xff]  ;;  %v1409_v36 = vld [vmem:[%s2345_s28 + $0x10] sm:$0xf0] }
  0x56   : > { %794 = vmatpush.bf16.msra.mxu1 %v1703_v10  ;;  %v1707_v27 = vld [vmem:[%s2352_s10 + $0x88] sm:$0xff]  ;;  %v1706_v31 = vld [vmem:[%s2352_s10 + $0x80] sm:$0xff]  ;;  %v1689_v38 = vld [vmem:[%s2345_s28 + $0x14] sm:$0xf0] }
  0x57   : > { %808 = vmatpush.bf16.msra.mxu2 %v1711_v11  ;;  %v1715_v28 = vld [vmem:[%s2352_s10 + $0xc8] sm:$0xff]  ;;  %v1714_v32 = vld [vmem:[%s2352_s10 + $0xc0] sm:$0xff]  ;;  %v1417_v40 = vld [vmem:[%s2345_s28 + $0x18] sm:$0xf0] }
  0x58   : > { %822 = vmatpush.bf16.msra.mxu3 %v1719_v12  ;;  %v1407_v33 = vld [vmem:[%s2345_s28] sm:$0xf]  ;;  %v1686_v35 = vld [vmem:[%s2345_s28 + $0x4] sm:$0xf]  ;;  %v1415_v37 = vld [vmem:[%s2345_s28 + $0x8] sm:$0xf] }
  0x59   : > { %781 = vmatpush.bf16.msra.mxu0 %v1694_v13  ;;  %v1687_v39 = vld [vmem:[%s2345_s28 + $0xc] sm:$0xf]  ;;  %v1408_v41 = vor.u32 %v1688_v34, %v1407_v33  ;;  %v1412_v42 = vor.u32 %v1686_v35, %v1409_v36  ;;  %v1416_v43 = vor.u32 %v1689_v38, %v1415_v37  ;;  %v496_v51 = vld [vmem:[#allocation2] sm:$0xff]  ;;  %v497_v59 = vld [vmem:[#allocation2 + $0x8] sm:$0xff] }
  0x5a   : > { %795 = vmatpush.bf16.msra.mxu1 %v1702_v14  ;;  %v1420_v44 = vor.u32 %v1687_v39, %v1417_v40 }
  0x5b   : > { %809 = vmatpush.bf16.msra.mxu2 %v1710_v15 }
  0x5c   : > { %823 = vmatpush.bf16.msra.mxu3 %v1718_v16 }
  0x5d   : > { %782 = vmatpush.bf16.msra.mxu0 %v1693_v17 }
  0x5e   : > { %796 = vmatpush.bf16.msra.mxu1 %v1701_v18 }
  0x5f   : > { %810 = vmatpush.bf16.msra.mxu2 %v1709_v19 }
  0x60   : > { %824 = vmatpush.bf16.msra.mxu3 %v1717_v20 }
  0x61   : > { %783 = vmatpush.bf16.msra.mxu0 %v1692_v21 }
  0x62   : > { %797 = vmatpush.bf16.msra.mxu1 %v1700_v22 }
  0x63   : > { %811 = vmatpush.bf16.msra.mxu2 %v1708_v23 }
  0x64   : > { %825 = vmatpush.bf16.msra.mxu3 %v1716_v24 }
  0x65   : > { %784 = vmatpush.bf16.msra.mxu0 %v1691_v25 }
  0x66   : > { %798 = vmatpush.bf16.msra.mxu1 %v1699_v26 }
  0x67   : > { %812 = vmatpush.bf16.msra.mxu2 %v1707_v27 }
  0x68   : > { %826 = vmatpush.bf16.msra.mxu3 %v1715_v28 }
  0x69   : > { %785 = vmatpush.bf16.msra.mxu0 %v1690_v29 }
  0x6a   : > { %799 = vmatpush.bf16.msra.mxu1 %v1698_v30 }
  0x6b   : > { %813 = vmatpush.bf16.msra.mxu2 %v1706_v31 }
  0x6c   : > { %827 = vmatpush.bf16.msra.mxu3 %v1714_v32  ;;  %786 = vmatmul.bf16.vlgmr.msra.gmra.mxu0 %v1408_v41 }
  0x6d   : > { %800 = vmatmul.bf16.vlgmr.msra.gmra.mxu1 %v1412_v42 }
  0x6e   : > { %814 = vmatmul.bf16.vlgmr.msra.gmra.mxu2 %v1416_v43 }
  0x6f   : > { %828 = vmatmul.bf16.vlgmr.msra.gmra.mxu3 %v1420_v44 }
  0xe9   : > { %v787_v45 = vpop.f32.mrf.mxu0 }
  0xea   : > { %v801_v46 = vpop.f32.mrf.mxu1 }
  0xeb   : > { %v802_v47 = vadd.f32 %v801_v46, %v787_v45 }
  0xf1   : > { %v815_v48 = vpop.f32.mrf.mxu2  ;;  %v789_v53 = vpop.f32.mrf.mxu0 }
  0xf2   : > { %v829_v49 = vpop.f32.mrf.mxu3  ;;  %v816_v50 = vadd.f32 %v815_v48, %v802_v47  ;;  %v803_v54 = vpop.f32.mrf.mxu1 }
  0xf3   : > { %v804_v56 = vadd.f32 %v803_v54, %v789_v53 }
  0xf4   : > { %v830_v52 = vadd.f32 %v829_v49, %v816_v50 }
  0xf6   : > { %v834_v55 = vadd.f32 %v830_v52, %v496_v51 }
  0xf8   : > { %836 = vst [vmem:[#allocation2] sm:$0xff] %v834_v55 }
  0xf9   : > { %v817_v57 = vpop.f32.mrf.mxu2 }
  0xfa   : > { %v818_v58 = vadd.f32 %v817_v57, %v804_v56  ;;  %v831_v60 = vpop.f32.mrf.mxu3 }
  0xfc   : > { %v832_v61 = vadd.f32 %v831_v60, %v818_v58  ;;  %841 = sbr.rel (%p1549_p1) target bundleno = 834 (0x342), region = 84 }
  0xfe   : > { %v835_v62 = vadd.f32 %v832_v61, %v497_v59 }
 0x100   : > { %837 = vst [vmem:[#allocation2 + $0x8] sm:$0xff] %v835_v62 }
 0x101   : > { %v1608_v63 = vld [vmem:[#allocation8 + $0x70] sm:$0xf]  ;;  %v1737_v0 = vld [vmem:[#allocation8 + $0x74] sm:$0xf0]  ;;  %v1736_v1 = vld [vmem:[#allocation8 + $0x74] sm:$0xf] }
 0x102   : > { %v1609_v2 = vor.u32 %v1737_v0, %v1608_v63  ;;  %v1610_v3 = vld [vmem:[#allocation8 + $0x78] sm:$0xf0]  ;;  %v1600_v4 = vld [vmem:[#allocation8 + $0x60] sm:$0xf]  ;;  %v1735_v5 = vld [vmem:[#allocation8 + $0x64] sm:$0xf0] }
 0x103   : > { %v1613_v6 = vor.u32 %v1736_v1, %v1610_v3  ;;  %v1734_v7 = vld [vmem:[#allocation8 + $0x64] sm:$0xf]  ;;  %v1602_v8 = vld [vmem:[#allocation8 + $0x68] sm:$0xf0]  ;;  %v1601_v9 = vor.u32 %v1735_v5, %v1600_v4  ;;  %v1592_v11 = vld [vmem:[#allocation8 + $0x50] sm:$0xf] }
 0x104   : > { %955 = vmatpush.bf16.msra.mxu0 %v1609_v2  ;;  %v1605_v10 = vor.u32 %v1734_v7, %v1602_v8  ;;  %v1733_v12 = vld [vmem:[#allocation8 + $0x54] sm:$0xf0]  ;;  %v1732_v13 = vld [vmem:[#allocation8 + $0x54] sm:$0xf]  ;;  %v1594_v14 = vld [vmem:[#allocation8 + $0x58] sm:$0xf0] }
 0x105   : > { %969 = vmatpush.bf16.msra.mxu1 %v1613_v6  ;;  %v1593_v15 = vor.u32 %v1733_v12, %v1592_v11  ;;  %v1597_v16 = vor.u32 %v1732_v13, %v1594_v14  ;;  %v1584_v17 = vld [vmem:[#allocation8 + $0x40] sm:$0xf]  ;;  %v1731_v18 = vld [vmem:[#allocation8 + $0x44] sm:$0xf0]  ;;  %v1730_v19 = vld [vmem:[#allocation8 + $0x44] sm:$0xf] }
 0x106   : > { %v1586_v20 = vld [vmem:[#allocation8 + $0x48] sm:$0xf0]  ;;  %v1585_v21 = vor.u32 %v1731_v18, %v1584_v17  ;;  %v1576_v22 = vld [vmem:[#allocation8 + $0x30] sm:$0xf]  ;;  %v1729_v24 = vld [vmem:[#allocation8 + $0x34] sm:$0xf0] }
 0x107   : > { %v1589_v23 = vor.u32 %v1730_v19, %v1586_v20  ;;  %v1745_v25 = vld [vmem:[#allocation9 + $0x38] sm:$0xff]  ;;  %v1728_v27 = vld [vmem:[#allocation8 + $0x34] sm:$0xf]  ;;  %v1577_v31 = vor.u32 %v1729_v24, %v1576_v22  ;;  %v1568_v33 = vld [vmem:[#allocation8 + $0x20] sm:$0xf]  ;;  %v1195_v24 = vlaneseq }
 0x108   : > { %956 = vmatpush.bf16.msra.mxu0 %v1601_v9  ;;  %v1753_v26 = vld [vmem:[#allocation11 + $0x38] sm:$0xff]  ;;  %1057 = vmatpush.bf16.msra.mxu2 %v1745_v25  ;;  %v1744_v29 = vld [vmem:[#allocation9 + $0x30] sm:$0xff]  ;;  %v1727_v34 = vld [vmem:[#allocation8 + $0x24] sm:$0xf0] }
 0x109   : > { %970 = vmatpush.bf16.msra.mxu1 %v1605_v10  ;;  %v1578_v28 = vld [vmem:[#allocation8 + $0x38] sm:$0xf0]  ;;  %1181 = vmatpush.bf16.msra.mxu3 %v1753_v26  ;;  %v1752_v30 = vld [vmem:[#allocation11 + $0x30] sm:$0xff]  ;;  %v1726_v35 = vld [vmem:[#allocation8 + $0x24] sm:$0xf]  ;;  %v1569_v40 = vor.u32 %v1727_v34, %v1568_v33  ;;  %v1196_v26 = vand.u32 127, %v1195_v24 }
 0x10a   : > { %v1581_v32 = vor.u32 %v1728_v27, %v1578_v28  ;;  %v1570_v36 = vld [vmem:[#allocation8 + $0x28] sm:$0xf0]  ;;  %v1869_v37 = vld [vmem:[%s2459_s2] ss:$0 sm:$0xff]  ;;  %v843_v42 = vld [vmem:[#allocation2 + $0x8] sm:$0xff] }
 0x10b   : > { %v1743_v38 = vld [vmem:[#allocation9 + $0x28] sm:$0xff]  ;;  %v842_v41 = vld [vmem:[#allocation2] sm:$0xff]  ;;  %v1573_v43 = vor.u32 %v1726_v35, %v1570_v36  ;;  %v1725_v45 = vld [vmem:[#allocation8 + $0x14] sm:$0xf0]  ;;  %v849_v49 = vadd.f32 %v1869_v37, %v843_v42  ;;  %vm1197_vm0 = vcmp.lt.s32.totalorder %v1196_v26, 8 }
 0x10c   : > { %957 = vmatpush.bf16.msra.mxu0 %v1593_v15  ;;  %1058 = vmatpush.bf16.msra.mxu2 %v1744_v29  ;;  %v1751_v39 = vld [vmem:[#allocation11 + $0x28] sm:$0xff]  ;;  %v1560_v44 = vld [vmem:[#allocation8 + $0x10] sm:$0xf]  ;;  %v1724_v46 = vld [vmem:[#allocation8 + $0x14] sm:$0xf]  ;;  %v848_v48 = vadd.f32 %v1869_v37, %v842_v41 }
 0x10d   : > { %971 = vmatpush.bf16.msra.mxu1 %v1597_v16  ;;  %1182 = vmatpush.bf16.msra.mxu3 %v1752_v30  ;;  %v1562_v47 = vld [vmem:[#allocation8 + $0x18] sm:$0xf0]  ;;  %v1742_v50 = vld [vmem:[#allocation9 + $0x20] sm:$0xff]  ;;  %v1561_v52 = vor.u32 %v1725_v45, %v1560_v44  ;;  %v1723_v55 = vld [vmem:[#allocation8 + $0x4] sm:$0xf0]  ;;  %v851_v59 = vmax.f32 %v849_v49, 0.0 }
 0x10e   : > { %v1750_v51 = vld [vmem:[#allocation11 + $0x20] sm:$0xff]  ;;  %v1565_v53 = vor.u32 %v1724_v46, %v1562_v47  ;;  %v1554_v57 = vld [vmem:[#allocation8 + $0x8] sm:$0xf0]  ;;  %v850_v58 = vmax.f32 %v848_v48, 0.0  ;;  %v1741_v63 = vld [vmem:[#allocation9 + $0x18] sm:$0xff] }
 0x10f   : > { %v1552_v54 = vld [vmem:[#allocation8] sm:$0xf]  ;;  %v1722_v56 = vld [vmem:[#allocation8 + $0x4] sm:$0xf]  ;;  %v1749_v0 = vld [vmem:[#allocation11 + $0x18] sm:$0xff] }
 0x110   : > { %958 = vmatpush.bf16.msra.mxu0 %v1585_v21  ;;  %1059 = vmatpush.bf16.msra.mxu2 %v1743_v38  ;;  %v1553_v60 = vor.u32 %v1723_v55, %v1552_v54  ;;  %v1557_v61 = vor.u32 %v1722_v56, %v1554_v57  ;;  %v852_v62 = vpack.c.bf16 %v851_v59, %v850_v58  ;;  %v1740_v1 = vld [vmem:[#allocation9 + $0x10] sm:$0xff]  ;;  %v1739_v3 = vld [vmem:[#allocation9 + $0x8] sm:$0xff]  ;;  %v1738_v5 = vld [vmem:[#allocation9] sm:$0xff] }
 0x111   : > { %972 = vmatpush.bf16.msra.mxu1 %v1589_v23  ;;  %1183 = vmatpush.bf16.msra.mxu3 %v1751_v39  ;;  %v1748_v2 = vld [vmem:[#allocation11 + $0x10] sm:$0xff]  ;;  %v1747_v4 = vld [vmem:[#allocation11 + $0x8] sm:$0xff]  ;;  %v1746_v6 = vld [vmem:[#allocation11] sm:$0xff] }
 0x112   : > { %v869_v7 = vld [vmem:[%s2461_s4] sm:$0x3] }
 0x113   : > { %v871_v9 = vperm.slane %v869_v7, 0  ;;  %v872_v11 = vperm.slane %v869_v7, 1  ;;  %v1870_v25 = vld [vmem:[%s2463_s6] ss:$0 sm:$0xff] }
 0x114   : > { %959 = vmatpush.bf16.msra.mxu0 %v1577_v31  ;;  %1060 = vmatpush.bf16.msra.mxu2 %v1742_v50  ;;  %v1871_v27 = vld [vmem:[%s2465_s8] ss:$0 sm:$0xff] }
 0x115   : > { %973 = vmatpush.bf16.msra.mxu1 %v1581_v32  ;;  %1184 = vmatpush.bf16.msra.mxu3 %v1750_v51 }
 0x118   : > { %960 = vmatpush.bf16.msra.mxu0 %v1569_v40  ;;  %1061 = vmatpush.bf16.msra.mxu2 %v1741_v63 }
 0x119   : > { %974 = vmatpush.bf16.msra.mxu1 %v1573_v43  ;;  %1185 = vmatpush.bf16.msra.mxu3 %v1749_v0 }
 0x11c   : > { %961 = vmatpush.bf16.msra.mxu0 %v1561_v52  ;;  %1062 = vmatpush.bf16.msra.mxu2 %v1740_v1 }
 0x11d   : > { %975 = vmatpush.bf16.msra.mxu1 %v1565_v53  ;;  %1186 = vmatpush.bf16.msra.mxu3 %v1748_v2 }
 0x120   : > { %962 = vmatpush.bf16.msra.mxu0 %v1553_v60  ;;  %1063 = vmatpush.bf16.msra.mxu2 %v1739_v3 }
 0x121   : > { %976 = vmatpush.bf16.msra.mxu1 %v1557_v61  ;;  %1187 = vmatpush.bf16.msra.mxu3 %v1747_v4 }
 0x123   : > { %963 = vmatmul.bf16.vlgmr.msra.gmra.mxu0 %v852_v62 }
 0x124   : > { %977 = vmatmul.bf16.vlgmr.msra.gmra.mxu1 %v852_v62  ;;  %1064 = vmatpush.bf16.msra.mxu2 %v1738_v5 }
 0x125   : > { %1188 = vmatpush.bf16.msra.mxu3 %v1746_v6 }
 0x1a0   : > { %v964_v8 = vpop.f32.mrf.mxu0 }
 0x1a1   : > { %v978_v10 = vpop.f32.mrf.mxu1  ;;  %v965_v12 = vadd.f32 %v964_v8, %v871_v9 }
 0x1a2   : > { %v979_v13 = vadd.f32 %v978_v10, %v872_v11 }
 0x1a3   : > { %v983_v15 = vmax.f32 %v965_v12, 0.0 }
 0x1a4   : > { %v984_v20 = vmax.f32 %v979_v13, 0.0 }
 0x1a8   : > { %v966_v14 = vpop.f32.mrf.mxu0 }
 0x1a9   : > { %v967_v16 = vadd.f32 %v966_v14, %v871_v9  ;;  %v980_v17 = vpop.f32.mrf.mxu1 }
 0x1aa   : > { %v981_v18 = vadd.f32 %v980_v17, %v872_v11 }
 0x1ab   : > { %v985_v19 = vmax.f32 %v967_v16, 0.0 }
 0x1ac   : > { %v986_v21 = vmax.f32 %v981_v18, 0.0 }
 0x1ad   : > { %v987_v22 = vpack.c.bf16 %v985_v19, %v983_v15 }
 0x1ae   : > { %v988_v23 = vpack.c.bf16 %v986_v21, %v984_v20 }
 0x1af   : > { %1065 = vmatmul.bf16.vlgmr.msra.gmra.mxu2 %v987_v22 }
 0x1b0   : > { %1189 = vmatmul.bf16.vlgmr.msra.gmra.mxu3 %v988_v23 }
 0x232   : > { %v1066_v28 = vpop.f32.mrf.mxu2 }
 0x233   : > { %v1067_v29 = vadd.f32 %v1870_v25, %v1066_v28  ;;  %v1190_v30 = vpop.f32.mrf.mxu3 }
 0x234   : > { %v1191_v31 = vadd.f32 %v1871_v27, %v1190_v30 }
 0x235   : > { %v1071_v32 = vmul.f32 %v1067_v29, %v1067_v29 }
 0x236   : > { %v1198_v33 = vsel %vm1197_vm0, %v1191_v31, -1e+30 }
 0x237   : > { %1200 = vmax.xlane.f32.xlu0 %v1198_v33  ;;  %1073 = vadd.xlane.f32.xlu1 %v1071_v32 }
 0x23a   : > { %v1068_v34 = vpop.f32.mrf.mxu2 }
 0x23b   : > { %v1069_v35 = vadd.f32 %v1870_v25, %v1068_v34  ;;  %v1192_v36 = vpop.f32.mrf.mxu3 }
 0x23c   : > { %v1193_v37 = vadd.f32 %v1871_v27, %v1192_v36 }
 0x23d   : > { %v1072_v38 = vmul.f32 %v1069_v35, %v1069_v35 }
 0x23e   : > { %v1199_v39 = vsel %vm1197_vm0, %v1193_v37, -1e+30 }
 0x23f   : > { %1202 = vmax.xlane.f32.xlu0 %v1199_v39  ;;  %1075 = vadd.xlane.f32.xlu1 %v1072_v38 }
 0x2aa   : > { %v1201_v40 = vpop.xlane.xlu0 %1200  ;;  %v1074_v41 = vpop.xlane.xlu1 %1073 }
 0x2ab   : > { %v1204_v42 = vsub.f32 %v1198_v33, %v1201_v40  ;;  %v1077_v43 = vmax.f32 %v1074_v41, 1e-24 }
 0x2ad   : > { %v1206_v44 = vmul.f32 1.442695, %v1204_v42  ;;  %1872 = vrsqrt.f32 %v1077_v43  ;;  %vm1085_vm1 = vweird.f32 %v1077_v43  ;;  %v1099_v57 = vmul.f32 0.5, %v1077_v43 }
 0x2af   : > { %1874 = vpow2.f32 %v1206_v44 }
 0x2b2   : > { %v1203_v45 = vpop.xlane.xlu0 %1202  ;;  %v1076_v46 = vpop.xlane.xlu1 %1075 }
 0x2b3   : > { %v1873_v47 = vpop.eup %1872  ;;  %v1205_v48 = vsub.f32 %v1199_v39, %v1203_v45  ;;  %v1078_v49 = vmax.f32 %v1076_v46, 1e-24 }
 0x2b4   : > { %v1080_v50 = vmul.f32 %v1873_v47, %v1077_v43  ;;  %vm1086_vm2 = vweird.f32 %v1873_v47 }
 0x2b5   : > { %v1875_v51 = vpop.eup %1874  ;;  %v1208_v52 = vmul.f32 1.442695, %v1205_v48  ;;  %1876 = vrsqrt.f32 %v1078_v49  ;;  %vm1087_vm3 = vmor %vm1085_vm1, %vm1086_vm2  ;;  %vm1095_vm4 = vweird.f32 %v1078_v49  ;;  %v1100_v4 = vmul.f32 0.5, %v1078_v49 }
 0x2b6   : > { %v1081_v53 = vmul.f32 %v1873_v47, %v1080_v50  ;;  %1210 = vadd.xlane.f32.xlu2 %v1875_v51 }
 0x2b7   : > { %1878 = vpow2.f32 %v1208_v52 }
 0x2b8   : > { %v1082_v54 = vmul.f32 0.5, %v1081_v53 }
 0x2ba   : > { %v1083_v55 = vsub.f32 1.5, %v1082_v54 }
 0x2bb   : > { %v1877_v56 = vpop.eup %1876 }
 0x2bc   : > { %v1084_v58 = vmul.f32 %v1873_v47, %v1083_v55  ;;  %v1090_v59 = vmul.f32 %v1877_v56, %v1078_v49  ;;  %vm1096_vm5 = vweird.f32 %v1877_v56 }
 0x2bd   : > { %v1879_v60 = vpop.eup %1878  ;;  %vm1097_vm6 = vmor %vm1095_vm4, %vm1096_vm5 }
 0x2be   : > { %v1088_v61 = vsel %vm1087_vm3, %v1873_v47, %v1084_v58  ;;  %v1091_v62 = vmul.f32 %v1877_v56, %v1090_v59  ;;  %1212 = vadd.xlane.f32.xlu2 %v1879_v60 }
 0x2bf   : > { %v1101_v63 = vmul.f32 %v1099_v57, %v1088_v61 }
 0x2c0   : > { %v1092_v0 = vmul.f32 0.5, %v1091_v62 }
 0x2c1   : > { %v1103_v1 = vmul.f32 %v1101_v63, %v1088_v61 }
 0x2c2   : > { %v1093_v2 = vsub.f32 1.5, %v1092_v0 }
 0x2c3   : > { %v1105_v3 = vsub.f32 1.5, %v1103_v1 }
 0x2c4   : > { %v1094_v5 = vmul.f32 %v1877_v56, %v1093_v2 }
 0x2c5   : > { %v1107_v6 = vmul.f32 %v1105_v3, %v1088_v61 }
 0x2c6   : > { %v1098_v7 = vsel %vm1097_vm6, %v1877_v56, %v1094_v5 }
 0x2c7   : > { %v1109_v8 = vmul.f32 %v1107_v6, %v1067_v29  ;;  %v1102_v9 = vmul.f32 %v1100_v4, %v1098_v7 }
 0x2c9   : > { %1111 = vst [vmem:[#allocation12] sm:$0xff] %v1109_v8  ;;  %v1104_v10 = vmul.f32 %v1102_v9, %v1098_v7 }
 0x2cb   : > { %v1106_v11 = vsub.f32 1.5, %v1104_v10 }
 0x2cd   : > { %v1108_v12 = vmul.f32 %v1106_v11, %v1098_v7 }
 0x2cf   : > { %v1110_v13 = vmul.f32 %v1108_v12, %v1069_v35 }
 0x2d1   : > { %1112 = vst [vmem:[#allocation12 + $0x8] sm:$0xff] %v1110_v13 }
 0x329   : > { %v1211_v14 = vpop.xlane.xlu2 %1210 }
 0x32a   : > { %1880 = vrcp.f32 %v1211_v14 }
 0x330   : > { %v1881_v15 = vpop.eup %1880 }
 0x331   : > { %v1216_v16 = vmul.f32 %v1881_v15, %v1211_v14  ;;  %v1213_v17 = vpop.xlane.xlu2 %1212 }
 0x332   : > { %1882 = vrcp.f32 %v1213_v17 }
 0x333   : > { %v1218_v18 = vsub.f32 2.0, %v1216_v16 }
 0x335   : > { %v1220_v19 = vmul.f32 %v1881_v15, %v1218_v18 }
 0x337   : > { %v1222_v20 = vmul.f32 %v1875_v51, %v1220_v19 }
 0x338   : > { %v1883_v21 = vpop.eup %1882 }
 0x339   : > { %1224 = vst [vmem:[#allocation13] sm:$0xff] %v1222_v20  ;;  %v1217_v22 = vmul.f32 %v1883_v21, %v1213_v17 }
 0x33b   : > { %v1219_v23 = vsub.f32 2.0, %v1217_v22 }
 0x33d   : > { %v1221_v24 = vmul.f32 %v1883_v21, %v1219_v23 }
 0x33f   : > { %v1223_v25 = vmul.f32 %v1879_v60, %v1221_v24 }
 0x341   : > { %1225 = vst [vmem:[#allocation13 + $0x8] sm:$0xff] %v1223_v25 }
 0x342 PF: > { %p1802_p3 = scmp.eq.s32.totalorder %s2261_s19, 1  ;;  %s2493_s11 = sld [smem:[#allocation29_spill]] }
 0x343   : > { %s2173_s21 = smov [#allocation12]   ;;  %s2174_s22 = smov 128  }
 0x344   : > { %s1234_s26 = sshll.u32 %s2173_s21, 4  ;;  %s2175_s7 = smov 8   ;;  %s1235_s26 = int_to_ptr.vmem [resolvable:$true] %s1234_s26 }
 0x345   : > { %s2176_s25 = smov [#allocation13]   ;;  %s2494_s5 = sld [smem:[#allocation30_spill]] }
 0x346   : > { %s1251_s30 = sshll.u32 %s2176_s25, 4  ;;  %s1252_s30 = int_to_ptr.vmem [resolvable:$true] %s1251_s30 }
 0x348   : > { %s1236_s23 = sshll.u32 %s2493_s11, 4  ;;  %s1237_s23 = int_to_ptr.hbm [resolvable:$true] %s1236_s23 }
 0x349   : > { %1771 = dma.vmem_to_hbm [thread:$0]  (%p1802_p3), %s1235_s26, 256, %s1237_s23, [#allocation5], %s2174_s22, %s2174_s22, %s2175_s7  }
 0x34b   : > { %s1253_s9 = sshll.u32 %s2494_s5, 4  ;;  %s1254_s9 = int_to_ptr.hbm [resolvable:$true] %s1253_s9 }
 0x34c   : > { %1773 = dma.vmem_to_hbm [thread:$0]  (%p1802_p3), %s1252_s30, 256, %s1254_s9, [#allocation14], %s2174_s22, %s2174_s22, %s2175_s7  }
 0x34d   : > { %2131 = dma.done.wait (%p1802_p3), [#allocation5], 256  }
 0x34e   : > { %2133 = vsyncadd (%p1802_p3), [#allocation5], 4294967040 }
 0x34f   : > { %2135 = dma.done.wait (%p1802_p3), [#allocation14], 256  }
 0x350   : > { %2137 = vsyncadd (%p1802_p3), [#allocation14], 4294967040 }
 0x351 PF: > { %s2495_s10 = sld [smem:[#allocation22_spill]]  ;;  %s2499_s13 = smov %s2144_s14 }
 0x352   : > { %s2496_s15 = sld [smem:[#allocation21_spill]] }
 0x353   : > { %s2497_s16 = sld [smem:[#allocation24_spill]] }
 0x354   : > { %s2498_s20 = sld [smem:[#allocation23_spill]] }
 0x357   : > { %s30_s18 = sadd.s32 1, %s2495_s10  }
 0x358   : > { %p27_p4 = scmp.ge.s32.totalorder %s30_s18, 4   ;;  %s2500_s14 = smov %s2496_s15 }
 0x359   : > { %s2501_s15 = smov %s2497_s16  ;;  %s2502_s16 = smov %s2156_s17 }
 0x35a   : > { %s2503_s17 = smov %s2498_s20  ;;  %29 = sbr.rel (!%p27_p4) target bundleno = 16 (0x10), region = 136 }
 0x35f   :  { %1275 = vsyncpa [#allocation4], 1 }
 0x360   :  { %1277 = vsyncpa [#allocation4 + $0x1], 1 }
 0x361   :  { %1278 = vsyncpa [#allocation7], 1 }
 0x362   :  { %1280 = vsyncpa [#allocation7 + $0x1], 1 }
 0x363   :  { %1281 = vsyncpa [#allocation10], 1 }
 0x364   :  { %1282 = vsyncpa [#allocation5], 1 }
 0x365   :  { %1284 = vsyncpa [#allocation5 + $0x1], 1 }
 0x366   :  { %1285 = vsyncpa [#allocation14], 1 }

</bundles_post_ra>
